<compile_context>
chip_gen: v5e
topology: v5e:2x2
jax: 0.10.0
libtpu: 0.0.40
codegen_flags: <defaults>
</compile_context>

<pallas_src>
import functools

import jax
import jax.numpy as jnp
import numpy as np
from jax.experimental import pallas as pl
from jax.experimental.pallas import tpu as pltpu

LANE = 128                      # lane-dense output width
VMEM_LIMIT = 32 * 1024 * 1024   # explicit, safe on v5e/v6e/v7x


# ------------------------------ small helpers ------------------------------ #

def _round_up(x, m):
    return (x + m - 1) // m * m


def _pad_to(a, shape):
    pads = [(0, t - s) for s, t in zip(a.shape, shape)]
    if all(p == (0, 0) for p in pads):
        return a
    return jnp.pad(a, pads)


def _largest_divisor(total, cap):
    t = max(1, min(total, cap))
    while total % t:
        t -= 1
    return t


def _pick_tile_m():
    """Generation-aware row tile: large on 128 MiB-VMEM parts (v5e/v6e),
    smaller on v7x (64 MiB per TensorCore).  Safe fallback if query fails."""
    try:
        vmem = int(pltpu.get_tpu_info().vmem_capacity_bytes)
        return 2048 if vmem >= 96 * 1024 * 1024 else 512
    except Exception:
        return 1024


# ----------------------------- Pallas kernels ------------------------------ #

def _matmul_bias_kernel(x_ref, w_ref, b_ref, o_ref, *, relu):
    """One M-tile of o = x @ w + b (optional ReLU). bf16 in, f32 MXU accumulate."""
    acc = jnp.dot(x_ref[...], w_ref[...], preferred_element_type=jnp.float32)
    acc = acc + b_ref[...]
    if relu:
        acc = jnp.maximum(acc, 0.0)
    o_ref[...] = acc.astype(o_ref.dtype)


def pallas_linear(x, w, b, *, relu, out_dtype, tile_m):
    """x:(M,K) bf16 @ w:(K,Npad) bf16 + b:(1,Npad) f32, tiled over M."""
    M, K = x.shape
    Kw, Npad = w.shape
    assert K == Kw, (K, Kw)
    tm = min(tile_m, M)
    return pl.pallas_call(
        functools.partial(_matmul_bias_kernel, relu=relu),
        out_shape=jax.ShapeDtypeStruct((M, Npad), out_dtype),
        grid_spec=pltpu.PrefetchScalarGridSpec(
            num_scalar_prefetch=0,
            grid=(pl.cdiv(M, tm),),
            in_specs=[pl.BlockSpec((tm, K), lambda i: (i, 0)),
                      pl.BlockSpec((K, Npad), lambda i: (0, 0)),
                      pl.BlockSpec((1, Npad), lambda i: (0, 0))],
            out_specs=pl.BlockSpec((tm, Npad), lambda i: (i, 0))),
        compiler_params=pltpu.CompilerParams(
            dimension_semantics=("parallel",),
            vmem_limit_bytes=VMEM_LIMIT),
    )(x, w, b)


def _maxpool_relu_kernel(x_ref, o_ref):
    """relu(2x2 max-pool).  Input block (2*tb, Wp, 2*Cpad): the W-neighbour is
    packed into the (lane-aligned) second half of the last dim, the H-neighbour
    is the next leading row — no strided HBM gathers needed."""
    tb, wp, cpad = o_ref.shape
    x = x_ref[...]                                     # (2*tb, wp, 2*cpad)
    m = jnp.maximum(x[:, :, :cpad], x[:, :, cpad:])    # pool along W (lane slice)
    m = m.reshape(tb, 2, wp, cpad)                     # leading-dim split: free
    m = jnp.maximum(m[:, 0], m[:, 1])                  # pool along H
    o_ref[...] = jnp.maximum(m, 0.0).astype(o_ref.dtype)


def pallas_maxpool2x2_relu(y_flat, n, ho, wo):
    """relu(max_pool2d(y, 2)) for y given as the conv matmul output (n*ho*wo, Cpad)."""
    cpad = y_flat.shape[-1]
    hp, wp = ho // 2, wo // 2
    x = y_flat.reshape(n * ho, wp, 2 * cpad)           # pure (contiguous) reshape
    B = n * hp
    tb = _largest_divisor(B, 256)
    out = pl.pallas_call(
        _maxpool_relu_kernel,
        out_shape=jax.ShapeDtypeStruct((B, wp, cpad), y_flat.dtype),
        grid_spec=pltpu.PrefetchScalarGridSpec(
            num_scalar_prefetch=0,
            grid=(B // tb,),
            in_specs=[pl.BlockSpec((2 * tb, wp, 2 * cpad), lambda i: (i, 0, 0))],
            out_specs=pl.BlockSpec((tb, wp, cpad), lambda i: (i, 0, 0))),
        compiler_params=pltpu.CompilerParams(
            dimension_semantics=("parallel",),
            vmem_limit_bytes=VMEM_LIMIT),
    )(x)
    return out.reshape(n, hp, wp, cpad)


def _mlp_kernel(x_ref, w1_ref, b1_ref, w2_ref, b2_ref, o_ref):
    """Fused fc1(+ReLU) -> fc2; the 256-wide hidden activation never leaves VMEM."""
    h = jnp.dot(x_ref[...], w1_ref[...], preferred_element_type=jnp.float32)
    h = jnp.maximum(h + b1_ref[...], 0.0)
    o = jnp.dot(h.astype(w2_ref.dtype), w2_ref[...],
                preferred_element_type=jnp.float32)
    o_ref[...] = (o + b2_ref[...]).astype(o_ref.dtype)


def pallas_mlp(x, w1, b1, w2, b2, *, tile_m):
    M, K1 = x.shape
    H = w1.shape[1]
    Npad = w2.shape[1]
    tm = min(tile_m, M)
    return pl.pallas_call(
        _mlp_kernel,
        out_shape=jax.ShapeDtypeStruct((M, Npad), jnp.float32),
        grid_spec=pltpu.PrefetchScalarGridSpec(
            num_scalar_prefetch=0,
            grid=(pl.cdiv(M, tm),),
            in_specs=[pl.BlockSpec((tm, K1), lambda i: (i, 0)),
                      pl.BlockSpec((K1, H), lambda i: (0, 0)),
                      pl.BlockSpec((1, H), lambda i: (0, 0)),
                      pl.BlockSpec((H, Npad), lambda i: (0, 0)),
                      pl.BlockSpec((1, Npad), lambda i: (0, 0))],
            out_specs=pl.BlockSpec((tm, Npad), lambda i: (i, 0))),
        compiler_params=pltpu.CompilerParams(
            dimension_semantics=("parallel",),
            vmem_limit_bytes=VMEM_LIMIT),
    )(x, w1, b1, w2, b2)


# ------------------------------ conv via im2col ---------------------------- #

def _im2col(x_nhwc, kh, kw, k_pad):
    # TODO(synk): the reviewer-suggested in-kernel 5x5 tap-accumulation (no
    # materialized im2col) is not implemented; window extraction remains XLA
    # glue feeding the tiled Pallas MXU matmul.
    n, h, w, c = x_nhwc.shape
    ho, wo = h - kh + 1, w - kw + 1
    cols = [x_nhwc[:, ki:ki + ho, kj:kj + wo, :]
            for ki in range(kh) for kj in range(kw)]
    patches = jnp.concatenate(cols, axis=-1).reshape(n * ho * wo, kh * kw * c)
    if k_pad > patches.shape[1]:
        patches = jnp.pad(patches, ((0, 0), (0, k_pad - patches.shape[1])))
    return patches, (n, ho, wo)


def pallas_conv2d(x_nhwc, layer, *, relu, tile_m):
    """VALID conv, stride 1.  Returns ((n*ho*wo, Cout_pad) bf16, (n, ho, wo))."""
    patches, dims = _im2col(x_nhwc, layer["kh"], layer["kw"], layer["k_pad"])
    out = pallas_linear(patches, layer["w"], layer["b"], relu=relu,
                        out_dtype=jnp.bfloat16, tile_m=tile_m)
    return out, dims


# -------------------------------- Net2 model ------------------------------- #

def init_params(key):
    """Deterministic init mimicking torch's default U(-1/sqrt(fan_in), +...)."""
    def uni(k, shape, fan_in):
        bound = 1.0 / np.sqrt(fan_in)
        return jax.random.uniform(k, shape, jnp.float32, -bound, bound)

    ks = jax.random.split(key, 10)
    return {
        "conv1_w": uni(ks[0], (32, 1, 5, 5), 1 * 5 * 5),
        "conv1_b": uni(ks[1], (32,), 1 * 5 * 5),
        "conv2_w": uni(ks[2], (32, 32, 5, 5), 32 * 5 * 5),
        "conv2_b": uni(ks[3], (32,), 32 * 5 * 5),
        "conv3_w": uni(ks[4], (64, 32, 2, 2), 32 * 2 * 2),
        "conv3_b": uni(ks[5], (64,), 32 * 2 * 2),
        "fc1_w": uni(ks[6], (200, 9 * 64), 9 * 64),   # torch Linear layout (out, in)
        "fc1_b": uni(ks[7], (200,), 9 * 64),
        "fc2_w": uni(ks[8], (10, 200), 200),
        "fc2_b": uni(ks[9], (10,), 200),
    }


def prepare_params(params):
    """One-time weight layout work hoisted out of the forward pass:
    conv OIHW -> (K, Cout) matmuls in im2col column order, K padded to a
    multiple of 8, Cout / fc widths zero-padded to lane-dense multiples of 128,
    weights in bf16 and biases in f32; fc1's columns are permuted to the NHWC
    flatten order so no runtime transpose is needed before fc1."""
    prep = {}
    for name, kh, kw in (("conv1", 5, 5), ("conv2", 5, 5), ("conv3", 2, 2)):
        w, b = params[name + "_w"], params[name + "_b"]
        cout, cin = w.shape[0], w.shape[1]
        k = kh * kw * cin
        k_pad = _round_up(k, 8)
        n_pad = _round_up(cout, LANE)
        w_mat = jnp.transpose(w, (2, 3, 1, 0)).reshape(k, cout)   # (ki,kj,cin) x cout
        prep[name] = {
            "w": _pad_to(w_mat, (k_pad, n_pad)).astype(jnp.bfloat16),
            "b": _pad_to(b.reshape(1, cout), (1, n_pad)).astype(jnp.float32),
            "kh": kh, "kw": kw, "cout": cout, "k_pad": k_pad,
        }

    # fc1: torch flattens NCHW (c*9 + h*3 + w); reorder columns to the NHWC
    # flatten order (h*3*64 + w*64 + c) produced by the conv3 output.
    nh, nin = params["fc1_w"].shape                          # (200, 576)
    w1 = (params["fc1_w"].reshape(nh, 64, 3, 3)
          .transpose(0, 2, 3, 1).reshape(nh, nin).T)         # (576, 200), NHWC rows
    h_pad = _round_up(nh, LANE)                              # 200 -> 256
    prep["fc"] = {
        "w1": _pad_to(w1, (nin, h_pad)).astype(jnp.bfloat16),
        "b1": _pad_to(params["fc1_b"].reshape(1, nh), (1, h_pad)).astype(jnp.float32),
        "w2": _pad_to(params["fc2_w"].T, (h_pad, LANE)).astype(jnp.bfloat16),
        "b2": _pad_to(params["fc2_b"].reshape(1, -1), (1, LANE)).astype(jnp.float32),
    }
    return prep


def net2_forward(prep, x_nchw, *, tile_m=None):
    if tile_m is None:
        tile_m = _pick_tile_m()
    n = x_nchw.shape[0]
    x = jnp.transpose(x_nchw, (0, 2, 3, 1)).astype(jnp.bfloat16)        # NHWC bf16

    # x = relu(max_pool2d(conv1(x), 2))
    c1 = prep["conv1"]
    y, (_, ho, wo) = pallas_conv2d(x, c1, relu=False, tile_m=tile_m)    # (n*24*24, 128)
    y = pallas_maxpool2x2_relu(y, n, ho, wo)[..., :c1["cout"]]          # (n,12,12,32)

    # x = relu(max_pool2d(conv2(x), 2))
    c2 = prep["conv2"]
    y, (_, ho, wo) = pallas_conv2d(y, c2, relu=False, tile_m=tile_m)    # (n*8*8, 128)
    y = pallas_maxpool2x2_relu(y, n, ho, wo)[..., :c2["cout"]]          # (n,4,4,32)

    # x = relu(conv3(x))
    c3 = prep["conv3"]
    y, (_, ho, wo) = pallas_conv2d(y, c3, relu=True, tile_m=tile_m)     # (n*3*3, 128)
    # Slice padding off BEFORE the flatten; NHWC flatten matches the permuted fc1.
    y = y[:, :c3["cout"]].reshape(n, ho * wo * c3["cout"])              # (n, 576)

    # x = fc2(relu(fc1(x)))  -- fused into a single Pallas call
    fc = prep["fc"]
    out = pallas_mlp(y, fc["w1"], fc["b1"], fc["w2"], fc["b2"], tile_m=tile_m)
    return out[:, :10]                                                  # (n, 10) f32


def net2_reference(params, x_nchw):
    """Pure-JAX f32 reference mirroring torch semantics, for verification."""
    def conv(x, w, b):
        y = jax.lax.conv_general_dilated(
            x, w, (1, 1), "VALID", dimension_numbers=("NCHW", "OIHW", "NCHW"))
        return y + b.reshape(1, -1, 1, 1)

    def maxpool2(x):
        n, c, h, w = x.shape
        return x.reshape(n, c, h // 2, 2, w // 2, 2).max(axis=(3, 5))

    relu = lambda v: jnp.maximum(v, 0.0)
    y = relu(maxpool2(conv(x_nchw, params["conv1_w"], params["conv1_b"])))
    y = relu(maxpool2(conv(y, params["conv2_w"], params["conv2_b"])))
    y = relu(conv(y, params["conv3_w"], params["conv3_b"]))
    y = y.reshape(y.shape[0], -1)
    y = relu(y @ params["fc1_w"].T + params["fc1_b"])
    return y @ params["fc2_w"].T + params["fc2_b"]


if __name__ == "__main__":
    key = jax.random.PRNGKey(0)
    kx, kp = jax.random.split(key)
    x = jax.random.normal(kx, (2, 1, 28, 28), dtype=jnp.float32)   # NCHW, like torch
    params = init_params(kp)
    prep = prepare_params(params)

    out = jax.block_until_ready(net2_forward(prep, x))
    assert out.shape == (2, 10) and out.dtype == jnp.float32

    ref = jax.block_until_ready(net2_reference(params, x))
    # bf16 inputs/weights with f32 MXU accumulation -> small numerical drift.
    np.testing.assert_allclose(np.asarray(out), np.asarray(ref), rtol=3e-2, atol=3e-2)

    print("KERNEL_OK")
</pallas_src>

<mosaic_0001>
module attributes {stable_mosaic.version = 11 : i64} {
  func.func @_matmul_bias_kernel(%arg0: i32, %arg1: memref<1024x32xbf16, #tpu.memory_space<vmem>>, %arg2: memref<32x128xbf16, #tpu.memory_space<vmem>>, %arg3: memref<1x128xf32, #tpu.memory_space<vmem>>, %arg4: memref<1024x128xbf16, #tpu.memory_space<vmem>>) attributes {dimension_semantics = [#tpu.dimension_semantics<parallel>], iteration_bounds = array<i64: 2>, scalar_prefetch = 0 : i64, scratch_operands = 0 : i64, tpu.core_type = #tpu.core_type<tc>, window_params = [{transform_indices = @transform_0, window_bounds = array<i64: 1024, 32>}, {pipeline_mode = #tpu.pipeline_mode<synchronous>, transform_indices = @transform_1, window_bounds = array<i64: 32, 128>}, {pipeline_mode = #tpu.pipeline_mode<synchronous>, transform_indices = @transform_2, window_bounds = array<i64: 1, 128>}, {transform_indices = @transform_3, window_bounds = array<i64: 1024, 128>}]} {
    %c0 = arith.constant 0 : index
    %c0_0 = arith.constant 0 : index
    %0 = vector.load %arg1[%c0, %c0_0] : memref<1024x32xbf16, #tpu.memory_space<vmem>>, vector<1024x32xbf16>
    %c0_1 = arith.constant 0 : index
    %c0_2 = arith.constant 0 : index
    %1 = vector.load %arg2[%c0_1, %c0_2] : memref<32x128xbf16, #tpu.memory_space<vmem>>, vector<32x128xbf16>
    %cst = arith.constant dense<0.000000e+00> : vector<1024x128xf32>
    %2 = tpu.matmul %0, %1, %cst {dimension_numbers = #tpu.dot_dimension_numbers<[1], [0], [0], [1], [0, 0, 1, 1], [], []>} : vector<1024x32xbf16>, vector<32x128xbf16>, vector<1024x128xf32> -> vector<1024x128xf32>
    %c0_3 = arith.constant 0 : index
    %c0_4 = arith.constant 0 : index
    %3 = vector.load %arg3[%c0_3, %c0_4] : memref<1x128xf32, #tpu.memory_space<vmem>>, vector<1x128xf32>
    %4 = vector.broadcast %3 : vector<1x128xf32> to vector<1024x128xf32>
    %5 = arith.addf %2, %4 : vector<1024x128xf32>
    %6 = arith.truncf %5 : vector<1024x128xf32> to vector<1024x128xbf16>
    %c0_5 = arith.constant 0 : index
    %c0_6 = arith.constant 0 : index
    %7 = vector.load %arg4[%c0_5, %c0_6] : memref<1024x128xbf16, #tpu.memory_space<vmem>>, vector<1024x128xbf16>
    tpu.vector_store %arg4[%c0_5, %c0_6], %6 {strides = array<i32>} : memref<1024x128xbf16, #tpu.memory_space<vmem>>, vector<1024x128xbf16>,
    return
  }
  func.func @transform_0(%arg0: i32) -> (i32, i32) {
    %c0_i32 = arith.constant 0 : i32
    %c0_i32_0 = arith.constant 0 : i32
    return %arg0, %c0_i32 : i32, i32
  }
  func.func @transform_1(%arg0: i32) -> (i32, i32) {
    %c0_i32 = arith.constant 0 : i32
    %c0_i32_0 = arith.constant 0 : i32
    %c0_i32_1 = arith.constant 0 : i32
    return %c0_i32, %c0_i32_0 : i32, i32
  }
  func.func @transform_2(%arg0: i32) -> (i32, i32) {
    %c0_i32 = arith.constant 0 : i32
    %c0_i32_0 = arith.constant 0 : i32
    %c0_i32_1 = arith.constant 0 : i32
    return %c0_i32, %c0_i32_0 : i32, i32
  }
  func.func @transform_3(%arg0: i32) -> (i32, i32) {
    %c0_i32 = arith.constant 0 : i32
    %c0_i32_0 = arith.constant 0 : i32
    return %arg0, %c0_i32 : i32, i32
  }
}

</mosaic_0001>

<bundles_post_ra>
// kernel: tpu_custom_call.1
= control target key start
LH: loop header
LB: loop body
LE: loop exit
PB: predicated region body
PF: predicated region fallthrough
CT: control target
= control target key end

     0   :  { %8 = vsyncpa [#allocation3], 0  ;;  %s2924_s0 = inlined_call_operand.vmem [shape: bf16[1152,32], index: 0, kind: input, shape index: {}]   ;;  %s2925_s1 = inlined_call_operand.vmem [shape: bf16[32,128], index: 1, kind: input, shape index: {}]   ;;  %s2926_s2 = inlined_call_operand.vmem [shape: f32[1,128], index: 2, kind: input, shape index: {}]   ;;  %s2927_s3 = inlined_call_operand.hbm [shape: bf16[1152,128], index: 3, kind: output, shape index: {}]  }
   0x1   :  { %10 = vsyncpa [#allocation3 + $0x1], 0  ;;  %s2467_s12 = smov 0   ;;  %s2469_s13 = smov 0  }
   0x2   :  { %s2471_s14 = smov 0   ;;  %s2473_s15 = smov 0  }
   0x3 LB: > { %s2488_s16 = sadd.s32 4294967295, %s2442_s15   ;;  %s1528_s17 = sadd.s32 4294967294, %s2442_s15   ;;  %s2442_s15 = sphi %s2473_s15, %s2934_s15   ;;  %s2438_s14 = sphi %s2471_s14, %s2933_s14   ;;  %s2434_s13 = sphi %s2469_s13, %s2932_s13   ;;  %s2430_s12 = sphi %s2467_s12, %s2931_s12  }
   0x4   : > { %s2492_s18 = sadd.s32 1, %s2442_s15   ;;  %s91_s19 = sadd.s32 1, %s2438_s14 }
   0x5   : > { %s88_s20 = ssub.s32 %s2442_s15, %s2492_s18  ;;  %p101_p0 = scmp.ne.s32.totalorder %s2438_s14, %s2434_s13 }
   0x6   : > { %p89_p1 = scmp.eq.s32.totalorder %s88_s20, 0  ;;  %p102_p2 = scmp.eq.s32.totalorder %s2488_s16, 1 }
   0x7   : > { %p107_p3 = scmp.ne.s32.totalorder %s2434_s13, %s2430_s12  ;;  %p108_p4 = scmp.eq.s32.totalorder %s1528_s17, 1 }
   0x8   : > { %s2503_s21 = scalar_select %p89_p1, %s2438_s14, %s91_s19  }
   0x9   : > { %p2505_p5 = por %p102_p2, %p101_p0  ;;  %p2509_p6 = por %p108_p4, %p107_p3 }
   0xa   : > { %p1531_p7 = scmp.ge.s32.totalorder %s2442_s15, 1  ;;  %p149_p8 = scmp.lt.s32.totalorder %s2442_s15, 3 }
   0xc   : > { %p150_p9 = pnand %p1531_p7, %p149_p8 }
   0xd   : > { %s2519_s26 = sshll.u32 (!%p150_p9), %s2488_s16, 7  ;;  %s174_s7 = sand.u32 (!%p150_p9), 1, %s2434_s13  }
   0xe   : > { %153 = sbr.rel (%p150_p9) target bundleno = 445 (0x1bd), region = 32  ;;  %p182_p10 = scmp.lt.s32.totalorder (!%p150_p9), %s2519_s26, 143 }
   0xf   : > { %s1532_s10 = sshll.u32 (!%p150_p9), %s174_s7, 9  ;;  %s2863_s17 = scalar_lea.sflag (!%p150_p9), [#allocation3], %s174_s7 }
  0x10   : > { %s2615_s11 = scalar_lea.vmem (!%p150_p9), [#allocation2], %s1532_s10 }
  0x13   : > { %v1937_v0 = vld [vmem:[%s2925_s1 + $0x8] sm:$0xff]  ;;  %v1936_v1 = vld [vmem:[%s2925_s1] sm:$0xff]  ;;  %s183_s29 = scalar_select %p182_p10, %s2519_s26, 143  ;;  %vm665_vm0 = vcmask 261120  }
  0x14   : > { %864 = vmatpush.bf16.msra.mxu0 %v1937_v0  ;;  %2322 = vmatpush.bf16.msra.mxu1 %v1937_v0  ;;  %v2607_v40 = vld [vmem:[%s2926_s2] ss:$0 sm:$0xff]  ;;  %s1452_s19 = ssub.s32 (%p2505_p5), 144, %s2519_s26 }
  0x15   : > { %2323 = vmatpush.bf16.msra.mxu2 %v1937_v0  ;;  %2324 = vmatpush.bf16.msra.mxu3 %v1937_v0  ;;  %s1534_s30 = sshll.u32 %s183_s29, 2  ;;  %p1453_p11 = scmp.lt.s32.totalorder (%p2505_p5), %s1452_s19, 128 }
  0x16   : > { %s2529_s6 = scalar_lea.vmem %s2924_s0, %s1534_s30 }
  0x17   : > { %v1872_v2 = vld [vmem:[%s2529_s6] sm:$0xff]  ;;  %v1873_v6 = vld [vmem:[%s2529_s6 + $0x8] sm:$0xff]  ;;  %v1874_v10 = vld [vmem:[%s2529_s6 + $0x10] sm:$0xff] }
  0x18   : > { %865 = vmatpush.bf16.msra.mxu0 %v1936_v1  ;;  %2325 = vmatpush.bf16.msra.mxu1 %v1936_v1  ;;  %v1888_v3 = vld [vmem:[%s2529_s6 + $0x80] sm:$0xff]  ;;  %v1889_v7 = vld [vmem:[%s2529_s6 + $0x88] sm:$0xff]  ;;  %v1890_v11 = vld [vmem:[%s2529_s6 + $0x90] sm:$0xff] }
  0x19   : > { %2326 = vmatpush.bf16.msra.mxu2 %v1936_v1  ;;  %2327 = vmatpush.bf16.msra.mxu3 %v1936_v1  ;;  %v1904_v4 = vld [vmem:[%s2529_s6 + $0x100] sm:$0xff]  ;;  %v1905_v8 = vld [vmem:[%s2529_s6 + $0x108] sm:$0xff]  ;;  %v1906_v12 = vld [vmem:[%s2529_s6 + $0x110] sm:$0xff] }
  0x1a   : > { %v1920_v5 = vld [vmem:[%s2529_s6 + $0x180] sm:$0xff]  ;;  %v1921_v9 = vld [vmem:[%s2529_s6 + $0x188] sm:$0xff]  ;;  %v1922_v13 = vld [vmem:[%s2529_s6 + $0x190] sm:$0xff] }
  0x1b   : > { %1799 = vmatmul.msk.bf16.vlgmr.msra.gmra.mxu0 %vm665_vm0, %v1872_v2  ;;  %1815 = vmatmul.msk.bf16.vlgmr.msra.gmra.mxu1 %vm665_vm0, %v1888_v3  ;;  %v1875_v14 = vld [vmem:[%s2529_s6 + $0x18] sm:$0xff]  ;;  %v1876_v18 = vld [vmem:[%s2529_s6 + $0x20] sm:$0xff]  ;;  %v1877_v22 = vld [vmem:[%s2529_s6 + $0x28] sm:$0xff] }
  0x1c   : > { %1831 = vmatmul.msk.bf16.vlgmr.msra.gmra.mxu2 %vm665_vm0, %v1904_v4  ;;  %1847 = vmatmul.msk.bf16.vlgmr.msra.gmra.mxu3 %vm665_vm0, %v1920_v5  ;;  %v1891_v15 = vld [vmem:[%s2529_s6 + $0x98] sm:$0xff]  ;;  %v1892_v19 = vld [vmem:[%s2529_s6 + $0xa0] sm:$0xff]  ;;  %v1893_v23 = vld [vmem:[%s2529_s6 + $0xa8] sm:$0xff] }
  0x1d   : > { %v1907_v16 = vld [vmem:[%s2529_s6 + $0x118] sm:$0xff]  ;;  %v1908_v20 = vld [vmem:[%s2529_s6 + $0x120] sm:$0xff]  ;;  %v1909_v24 = vld [vmem:[%s2529_s6 + $0x128] sm:$0xff] }
  0x1e   : > { %v1923_v17 = vld [vmem:[%s2529_s6 + $0x198] sm:$0xff]  ;;  %v1924_v21 = vld [vmem:[%s2529_s6 + $0x1a0] sm:$0xff]  ;;  %v1925_v25 = vld [vmem:[%s2529_s6 + $0x1a8] sm:$0xff] }
  0x1f   : > { %v1878_v26 = vld [vmem:[%s2529_s6 + $0x30] sm:$0xff]  ;;  %v1879_v30 = vld [vmem:[%s2529_s6 + $0x38] sm:$0xff]  ;;  %v1880_v34 = vld [vmem:[%s2529_s6 + $0x40] sm:$0xff] }
  0x20   : > { %v1894_v27 = vld [vmem:[%s2529_s6 + $0xb0] sm:$0xff]  ;;  %v1895_v31 = vld [vmem:[%s2529_s6 + $0xb8] sm:$0xff]  ;;  %v1896_v35 = vld [vmem:[%s2529_s6 + $0xc0] sm:$0xff] }
  0x21   : > { %v1910_v28 = vld [vmem:[%s2529_s6 + $0x130] sm:$0xff]  ;;  %v1911_v32 = vld [vmem:[%s2529_s6 + $0x138] sm:$0xff]  ;;  %v1912_v38 = vld [vmem:[%s2529_s6 + $0x140] sm:$0xff] }
  0x22   : > { %v1926_v29 = vld [vmem:[%s2529_s6 + $0x1b0] sm:$0xff]  ;;  %v1927_v33 = vld [vmem:[%s2529_s6 + $0x1b8] sm:$0xff]  ;;  %v1928_v39 = vld [vmem:[%s2529_s6 + $0x1c0] sm:$0xff] }
  0x23   : > { %v1881_v53 = vld [vmem:[%s2529_s6 + $0x48] sm:$0xff] }
  0x24   : > { %v1897_v54 = vld [vmem:[%s2529_s6 + $0xc8] sm:$0xff] }
  0x25   : > { %v1913_v61 = vld [vmem:[%s2529_s6 + $0x148] sm:$0xff] }
  0x26   : > { %v1929_v62 = vld [vmem:[%s2529_s6 + $0x1c8] sm:$0xff] }
  0x2b   : > { %1800 = vmatmul.msk.bf16.gmra.mxu0 %vm665_vm0, %v1873_v6  ;;  %1816 = vmatmul.msk.bf16.gmra.mxu1 %vm665_vm0, %v1889_v7 }
  0x2c   : > { %1832 = vmatmul.msk.bf16.gmra.mxu2 %vm665_vm0, %v1905_v8  ;;  %1848 = vmatmul.msk.bf16.gmra.mxu3 %vm665_vm0, %v1921_v9 }
  0x3b   : > { %1801 = vmatmul.msk.bf16.gmra.mxu0 %vm665_vm0, %v1874_v10  ;;  %1817 = vmatmul.msk.bf16.gmra.mxu1 %vm665_vm0, %v1890_v11 }
  0x3c   : > { %1833 = vmatmul.msk.bf16.gmra.mxu2 %vm665_vm0, %v1906_v12  ;;  %1849 = vmatmul.msk.bf16.gmra.mxu3 %vm665_vm0, %v1922_v13  ;;  %v1882_v13 = vld [vmem:[%s2529_s6 + $0x50] sm:$0xff] }
  0x4b   : > { %1802 = vmatmul.msk.bf16.gmra.mxu0 %vm665_vm0, %v1875_v14  ;;  %1818 = vmatmul.msk.bf16.gmra.mxu1 %vm665_vm0, %v1891_v15  ;;  %v1898_v14 = vld [vmem:[%s2529_s6 + $0xd0] sm:$0xff] }
  0x4c   : > { %1834 = vmatmul.msk.bf16.gmra.mxu2 %vm665_vm0, %v1907_v16  ;;  %1850 = vmatmul.msk.bf16.gmra.mxu3 %vm665_vm0, %v1923_v17 }
  0x5b   : > { %1803 = vmatmul.msk.bf16.gmra.mxu0 %vm665_vm0, %v1876_v18  ;;  %1819 = vmatmul.msk.bf16.gmra.mxu1 %vm665_vm0, %v1892_v19 }
  0x5c   : > { %1835 = vmatmul.msk.bf16.gmra.mxu2 %vm665_vm0, %v1908_v20  ;;  %1851 = vmatmul.msk.bf16.gmra.mxu3 %vm665_vm0, %v1924_v21  ;;  %v1914_v21 = vld [vmem:[%s2529_s6 + $0x150] sm:$0xff] }
  0x6b   : > { %1804 = vmatmul.msk.bf16.gmra.mxu0 %vm665_vm0, %v1877_v22  ;;  %1820 = vmatmul.msk.bf16.gmra.mxu1 %vm665_vm0, %v1893_v23  ;;  %v1930_v22 = vld [vmem:[%s2529_s6 + $0x1d0] sm:$0xff] }
  0x6c   : > { %1836 = vmatmul.msk.bf16.gmra.mxu2 %vm665_vm0, %v1909_v24  ;;  %1852 = vmatmul.msk.bf16.gmra.mxu3 %vm665_vm0, %v1925_v25 }
  0x7b   : > { %1805 = vmatmul.msk.bf16.gmra.mxu0 %vm665_vm0, %v1878_v26  ;;  %1821 = vmatmul.msk.bf16.gmra.mxu1 %vm665_vm0, %v1894_v27 }
  0x7c   : > { %1837 = vmatmul.msk.bf16.gmra.mxu2 %vm665_vm0, %v1910_v28  ;;  %1853 = vmatmul.msk.bf16.gmra.mxu3 %vm665_vm0, %v1926_v29 }
  0x8b   : > { %1806 = vmatmul.msk.bf16.gmra.mxu0 %vm665_vm0, %v1879_v30  ;;  %1822 = vmatmul.msk.bf16.gmra.mxu1 %vm665_vm0, %v1895_v31 }
  0x8c   : > { %1838 = vmatmul.msk.bf16.gmra.mxu2 %vm665_vm0, %v1911_v32  ;;  %1854 = vmatmul.msk.bf16.gmra.mxu3 %vm665_vm0, %v1927_v33 }
  0x98   : > { %v867_v36 = vpop.f32.mrf.mxu0  ;;  %v947_v37 = vpop.f32.mrf.mxu1 }
  0x99   : > { %v868_v45 = vadd.f32 %v2607_v40, %v867_v36  ;;  %v948_v46 = vadd.f32 %v2607_v40, %v947_v37  ;;  %v1883_v37 = vld [vmem:[%s2529_s6 + $0x58] sm:$0xff] }
  0x9b   : > { %1807 = vmatmul.msk.bf16.gmra.mxu0 %vm665_vm0, %v1880_v34  ;;  %1823 = vmatmul.msk.bf16.gmra.mxu1 %vm665_vm0, %v1896_v35 }
  0x9c   : > { %1839 = vmatmul.msk.bf16.gmra.mxu2 %vm665_vm0, %v1912_v38  ;;  %1855 = vmatmul.msk.bf16.gmra.mxu3 %vm665_vm0, %v1928_v39  ;;  %v1899_v38 = vld [vmem:[%s2529_s6 + $0xd8] sm:$0xff] }
  0x9f   : > { %v1027_v41 = vpop.f32.mrf.mxu2  ;;  %v1107_v42 = vpop.f32.mrf.mxu3 }
  0xa0   : > { %v869_v43 = vpop.f32.mrf.mxu0  ;;  %v949_v44 = vpop.f32.mrf.mxu1  ;;  %v1028_v55 = vadd.f32 %v2607_v40, %v1027_v41  ;;  %v1108_v56 = vadd.f32 %v2607_v40, %v1107_v42 }
  0xa1   : > { %v870_v47 = vadd.f32 %v2607_v40, %v869_v43  ;;  %v950_v48 = vadd.f32 %v2607_v40, %v949_v44 }
  0xa3   : > { %v1942_v49 = vpack.c.bf16 %v870_v47, %v868_v45  ;;  %v2022_v50 = vpack.c.bf16 %v950_v48, %v948_v46  ;;  %v1915_v46 = vld [vmem:[%s2529_s6 + $0x158] sm:$0xff] }
  0xa4   : > { %v1931_v47 = vld [vmem:[%s2529_s6 + $0x1d8] sm:$0xff] }
  0xa5   : > { %1943 = vst [vmem:[%s2615_s11] sm:$0xff] %v1942_v49  }
  0xa6   : > { %2274 = vst [vmem:[%s2615_s11 + $0x80] sm:$0xff] %v2022_v50  }
  0xa7   : > { %v1029_v51 = vpop.f32.mrf.mxu2  ;;  %v1109_v52 = vpop.f32.mrf.mxu3 }
  0xa8   : > { %v1030_v57 = vadd.f32 %v2607_v40, %v1029_v51  ;;  %v1110_v58 = vadd.f32 %v2607_v40, %v1109_v52  ;;  %v872_v59 = vpop.f32.mrf.mxu0  ;;  %v952_v60 = vpop.f32.mrf.mxu1 }
  0xa9   : > { %v873_v5 = vadd.f32 %v2607_v40, %v872_v59  ;;  %v953_v6 = vadd.f32 %v2607_v40, %v952_v60 }
  0xaa   : > { %v2102_v63 = vpack.c.bf16 %v1030_v57, %v1028_v55  ;;  %v2182_v0 = vpack.c.bf16 %v1110_v58, %v1108_v56 }
  0xab   : > { %1808 = vmatmul.msk.bf16.gmra.mxu0 %vm665_vm0, %v1881_v53  ;;  %1824 = vmatmul.msk.bf16.gmra.mxu1 %vm665_vm0, %v1897_v54 }
  0xac   : > { %2290 = vst [vmem:[%s2615_s11 + $0x100] sm:$0xff] %v2102_v63   ;;  %1840 = vmatmul.msk.bf16.gmra.mxu2 %vm665_vm0, %v1913_v61  ;;  %1856 = vmatmul.msk.bf16.gmra.mxu3 %vm665_vm0, %v1929_v62  ;;  %v1884_v62 = vld [vmem:[%s2529_s6 + $0x60] sm:$0xff] }
  0xad   : > { %2306 = vst [vmem:[%s2615_s11 + $0x180] sm:$0xff] %v2182_v0   ;;  %v1900_v63 = vld [vmem:[%s2529_s6 + $0xe0] sm:$0xff] }
  0xaf   : > { %v1032_v1 = vpop.f32.mrf.mxu2  ;;  %v1112_v2 = vpop.f32.mrf.mxu3 }
  0xb0   : > { %v874_v3 = vpop.f32.mrf.mxu0  ;;  %v954_v4 = vpop.f32.mrf.mxu1  ;;  %v1033_v15 = vadd.f32 %v2607_v40, %v1032_v1  ;;  %v1113_v16 = vadd.f32 %v2607_v40, %v1112_v2 }
  0xb1   : > { %v875_v7 = vadd.f32 %v2607_v40, %v874_v3  ;;  %v955_v8 = vadd.f32 %v2607_v40, %v954_v4 }
  0xb3   : > { %v1947_v9 = vpack.c.bf16 %v875_v7, %v873_v5  ;;  %v2027_v10 = vpack.c.bf16 %v955_v8, %v953_v6  ;;  %v1916_v6 = vld [vmem:[%s2529_s6 + $0x160] sm:$0xff] }
  0xb4   : > { %v1932_v7 = vld [vmem:[%s2529_s6 + $0x1e0] sm:$0xff] }
  0xb5   : > { %2259 = vst [vmem:[%s2615_s11 + $0x8] sm:$0xff] %v1947_v9  }
  0xb6   : > { %2275 = vst [vmem:[%s2615_s11 + $0x88] sm:$0xff] %v2027_v10  }
  0xb7   : > { %v1034_v11 = vpop.f32.mrf.mxu2  ;;  %v1114_v12 = vpop.f32.mrf.mxu3 }
  0xb8   : > { %v1035_v17 = vadd.f32 %v2607_v40, %v1034_v11  ;;  %v1115_v18 = vadd.f32 %v2607_v40, %v1114_v12  ;;  %v877_v19 = vpop.f32.mrf.mxu0  ;;  %v957_v20 = vpop.f32.mrf.mxu1 }
  0xb9   : > { %v878_v29 = vadd.f32 %v2607_v40, %v877_v19  ;;  %v958_v30 = vadd.f32 %v2607_v40, %v957_v20 }
  0xba   : > { %v2107_v23 = vpack.c.bf16 %v1035_v17, %v1033_v15  ;;  %v2187_v24 = vpack.c.bf16 %v1115_v18, %v1113_v16 }
  0xbb   : > { %1809 = vmatmul.msk.bf16.gmra.mxu0 %vm665_vm0, %v1882_v13  ;;  %1825 = vmatmul.msk.bf16.gmra.mxu1 %vm665_vm0, %v1898_v14 }
  0xbc   : > { %2291 = vst [vmem:[%s2615_s11 + $0x108] sm:$0xff] %v2107_v23   ;;  %1841 = vmatmul.msk.bf16.gmra.mxu2 %vm665_vm0, %v1914_v21  ;;  %1857 = vmatmul.msk.bf16.gmra.mxu3 %vm665_vm0, %v1930_v22  ;;  %v1885_v22 = vld [vmem:[%s2529_s6 + $0x68] sm:$0xff] }
  0xbd   : > { %2307 = vst [vmem:[%s2615_s11 + $0x188] sm:$0xff] %v2187_v24   ;;  %v1901_v23 = vld [vmem:[%s2529_s6 + $0xe8] sm:$0xff] }
  0xbf   : > { %v1037_v25 = vpop.f32.mrf.mxu2  ;;  %v1117_v26 = vpop.f32.mrf.mxu3 }
  0xc0   : > { %v879_v27 = vpop.f32.mrf.mxu0  ;;  %v959_v28 = vpop.f32.mrf.mxu1  ;;  %v1038_v39 = vadd.f32 %v2607_v40, %v1037_v25  ;;  %v1118_v41 = vadd.f32 %v2607_v40, %v1117_v26 }
  0xc1   : > { %v880_v31 = vadd.f32 %v2607_v40, %v879_v27  ;;  %v960_v32 = vadd.f32 %v2607_v40, %v959_v28 }
  0xc3   : > { %v1952_v33 = vpack.c.bf16 %v880_v31, %v878_v29  ;;  %v2032_v34 = vpack.c.bf16 %v960_v32, %v958_v30  ;;  %v1917_v30 = vld [vmem:[%s2529_s6 + $0x168] sm:$0xff] }
  0xc4   : > { %v1933_v31 = vld [vmem:[%s2529_s6 + $0x1e8] sm:$0xff] }
  0xc5   : > { %2260 = vst [vmem:[%s2615_s11 + $0x10] sm:$0xff] %v1952_v33  }
  0xc6   : > { %2276 = vst [vmem:[%s2615_s11 + $0x90] sm:$0xff] %v2032_v34  }
  0xc7   : > { %v1039_v35 = vpop.f32.mrf.mxu2  ;;  %v1119_v36 = vpop.f32.mrf.mxu3 }
  0xc8   : > { %v1040_v42 = vadd.f32 %v2607_v40, %v1039_v35  ;;  %v1120_v43 = vadd.f32 %v2607_v40, %v1119_v36  ;;  %v882_v44 = vpop.f32.mrf.mxu0  ;;  %v962_v45 = vpop.f32.mrf.mxu1 }
  0xc9   : > { %v883_v54 = vadd.f32 %v2607_v40, %v882_v44  ;;  %v963_v55 = vadd.f32 %v2607_v40, %v962_v45 }
  0xca   : > { %v2112_v48 = vpack.c.bf16 %v1040_v42, %v1038_v39  ;;  %v2192_v49 = vpack.c.bf16 %v1120_v43, %v1118_v41 }
  0xcb   : > { %1810 = vmatmul.msk.bf16.gmra.mxu0 %vm665_vm0, %v1883_v37  ;;  %1826 = vmatmul.msk.bf16.gmra.mxu1 %vm665_vm0, %v1899_v38 }
  0xcc   : > { %2292 = vst [vmem:[%s2615_s11 + $0x110] sm:$0xff] %v2112_v48   ;;  %1842 = vmatmul.msk.bf16.gmra.mxu2 %vm665_vm0, %v1915_v46  ;;  %1858 = vmatmul.msk.bf16.gmra.mxu3 %vm665_vm0, %v1931_v47  ;;  %v1886_v47 = vld [vmem:[%s2529_s6 + $0x70] sm:$0xff] }
  0xcd   : > { %2308 = vst [vmem:[%s2615_s11 + $0x190] sm:$0xff] %v2192_v49   ;;  %v1902_v48 = vld [vmem:[%s2529_s6 + $0xf0] sm:$0xff] }
  0xcf   : > { %v1042_v50 = vpop.f32.mrf.mxu2  ;;  %v1122_v51 = vpop.f32.mrf.mxu3 }
  0xd0   : > { %v884_v52 = vpop.f32.mrf.mxu0  ;;  %v964_v53 = vpop.f32.mrf.mxu1  ;;  %v1043_v0 = vadd.f32 %v2607_v40, %v1042_v50  ;;  %v1123_v1 = vadd.f32 %v2607_v40, %v1122_v51 }
  0xd1   : > { %v885_v56 = vadd.f32 %v2607_v40, %v884_v52  ;;  %v965_v57 = vadd.f32 %v2607_v40, %v964_v53 }
  0xd3   : > { %v1957_v58 = vpack.c.bf16 %v885_v56, %v883_v54  ;;  %v2037_v59 = vpack.c.bf16 %v965_v57, %v963_v55  ;;  %v1918_v55 = vld [vmem:[%s2529_s6 + $0x170] sm:$0xff] }
  0xd4   : > { %v1934_v56 = vld [vmem:[%s2529_s6 + $0x1f0] sm:$0xff] }
  0xd5   : > { %2261 = vst [vmem:[%s2615_s11 + $0x18] sm:$0xff] %v1957_v58  }
  0xd6   : > { %2277 = vst [vmem:[%s2615_s11 + $0x98] sm:$0xff] %v2037_v59  }
  0xd7   : > { %v1044_v60 = vpop.f32.mrf.mxu2  ;;  %v1124_v61 = vpop.f32.mrf.mxu3 }
  0xd8   : > { %v1045_v2 = vadd.f32 %v2607_v40, %v1044_v60  ;;  %v1125_v3 = vadd.f32 %v2607_v40, %v1124_v61  ;;  %v887_v4 = vpop.f32.mrf.mxu0  ;;  %v967_v5 = vpop.f32.mrf.mxu1 }
  0xd9   : > { %v888_v14 = vadd.f32 %v2607_v40, %v887_v4  ;;  %v968_v15 = vadd.f32 %v2607_v40, %v967_v5 }
  0xda   : > { %v2117_v8 = vpack.c.bf16 %v1045_v2, %v1043_v0  ;;  %v2197_v9 = vpack.c.bf16 %v1125_v3, %v1123_v1 }
  0xdb   : > { %1811 = vmatmul.msk.bf16.gmra.mxu0 %vm665_vm0, %v1884_v62  ;;  %1827 = vmatmul.msk.bf16.gmra.mxu1 %vm665_vm0, %v1900_v63 }
  0xdc   : > { %2293 = vst [vmem:[%s2615_s11 + $0x118] sm:$0xff] %v2117_v8   ;;  %1843 = vmatmul.msk.bf16.gmra.mxu2 %vm665_vm0, %v1916_v6  ;;  %1859 = vmatmul.msk.bf16.gmra.mxu3 %vm665_vm0, %v1932_v7  ;;  %v1887_v7 = vld [vmem:[%s2529_s6 + $0x78] sm:$0xff] }
  0xdd   : > { %2309 = vst [vmem:[%s2615_s11 + $0x198] sm:$0xff] %v2197_v9   ;;  %v1903_v8 = vld [vmem:[%s2529_s6 + $0xf8] sm:$0xff] }
  0xdf   : > { %v1047_v10 = vpop.f32.mrf.mxu2  ;;  %v1127_v11 = vpop.f32.mrf.mxu3 }
  0xe0   : > { %v889_v12 = vpop.f32.mrf.mxu0  ;;  %v969_v13 = vpop.f32.mrf.mxu1  ;;  %v1048_v24 = vadd.f32 %v2607_v40, %v1047_v10  ;;  %v1128_v25 = vadd.f32 %v2607_v40, %v1127_v11 }
  0xe1   : > { %v890_v16 = vadd.f32 %v2607_v40, %v889_v12  ;;  %v970_v17 = vadd.f32 %v2607_v40, %v969_v13 }
  0xe3   : > { %v1962_v18 = vpack.c.bf16 %v890_v16, %v888_v14  ;;  %v2042_v19 = vpack.c.bf16 %v970_v17, %v968_v15  ;;  %v1919_v15 = vld [vmem:[%s2529_s6 + $0x178] sm:$0xff] }
  0xe4   : > { %v1935_v16 = vld [vmem:[%s2529_s6 + $0x1f8] sm:$0xff] }
  0xe5   : > { %2262 = vst [vmem:[%s2615_s11 + $0x20] sm:$0xff] %v1962_v18  }
  0xe6   : > { %2278 = vst [vmem:[%s2615_s11 + $0xa0] sm:$0xff] %v2042_v19  }
  0xe7   : > { %v1049_v20 = vpop.f32.mrf.mxu2  ;;  %v1129_v21 = vpop.f32.mrf.mxu3 }
  0xe8   : > { %v1050_v26 = vadd.f32 %v2607_v40, %v1049_v20  ;;  %v1130_v27 = vadd.f32 %v2607_v40, %v1129_v21  ;;  %v892_v28 = vpop.f32.mrf.mxu0  ;;  %v972_v29 = vpop.f32.mrf.mxu1 }
  0xe9   : > { %v893_v38 = vadd.f32 %v2607_v40, %v892_v28  ;;  %v973_v39 = vadd.f32 %v2607_v40, %v972_v29 }
  0xea   : > { %v2122_v32 = vpack.c.bf16 %v1050_v26, %v1048_v24  ;;  %v2202_v33 = vpack.c.bf16 %v1130_v27, %v1128_v25 }
  0xeb   : > { %1812 = vmatmul.msk.bf16.gmra.mxu0 %vm665_vm0, %v1885_v22  ;;  %1828 = vmatmul.msk.bf16.gmra.mxu1 %vm665_vm0, %v1901_v23 }
  0xec   : > { %2294 = vst [vmem:[%s2615_s11 + $0x120] sm:$0xff] %v2122_v32   ;;  %1844 = vmatmul.msk.bf16.gmra.mxu2 %vm665_vm0, %v1917_v30  ;;  %1860 = vmatmul.msk.bf16.gmra.mxu3 %vm665_vm0, %v1933_v31 }
  0xed   : > { %2310 = vst [vmem:[%s2615_s11 + $0x1a0] sm:$0xff] %v2202_v33  }
  0xef   : > { %v1052_v34 = vpop.f32.mrf.mxu2  ;;  %v1132_v35 = vpop.f32.mrf.mxu3 }
  0xf0   : > { %v894_v36 = vpop.f32.mrf.mxu0  ;;  %v974_v37 = vpop.f32.mrf.mxu1  ;;  %v1053_v49 = vadd.f32 %v2607_v40, %v1052_v34  ;;  %v1133_v50 = vadd.f32 %v2607_v40, %v1132_v35 }
  0xf1   : > { %v895_v41 = vadd.f32 %v2607_v40, %v894_v36  ;;  %v975_v42 = vadd.f32 %v2607_v40, %v974_v37 }
  0xf3   : > { %v1967_v43 = vpack.c.bf16 %v895_v41, %v893_v38  ;;  %v2047_v44 = vpack.c.bf16 %v975_v42, %v973_v39 }
  0xf5   : > { %2263 = vst [vmem:[%s2615_s11 + $0x28] sm:$0xff] %v1967_v43  }
  0xf6   : > { %2279 = vst [vmem:[%s2615_s11 + $0xa8] sm:$0xff] %v2047_v44  }
  0xf7   : > { %v1054_v45 = vpop.f32.mrf.mxu2  ;;  %v1134_v46 = vpop.f32.mrf.mxu3 }
  0xf8   : > { %v1055_v51 = vadd.f32 %v2607_v40, %v1054_v45  ;;  %v1135_v52 = vadd.f32 %v2607_v40, %v1134_v46  ;;  %v897_v53 = vpop.f32.mrf.mxu0  ;;  %v977_v54 = vpop.f32.mrf.mxu1 }
  0xf9   : > { %v898_v63 = vadd.f32 %v2607_v40, %v897_v53  ;;  %v978_v0 = vadd.f32 %v2607_v40, %v977_v54 }
  0xfa   : > { %v2127_v57 = vpack.c.bf16 %v1055_v51, %v1053_v49  ;;  %v2207_v58 = vpack.c.bf16 %v1135_v52, %v1133_v50 }
  0xfb   : > { %1813 = vmatmul.msk.bf16.gmra.mxu0 %vm665_vm0, %v1886_v47  ;;  %1829 = vmatmul.msk.bf16.gmra.mxu1 %vm665_vm0, %v1902_v48 }
  0xfc   : > { %2295 = vst [vmem:[%s2615_s11 + $0x128] sm:$0xff] %v2127_v57   ;;  %1845 = vmatmul.msk.bf16.gmra.mxu2 %vm665_vm0, %v1918_v55  ;;  %1861 = vmatmul.msk.bf16.gmra.mxu3 %vm665_vm0, %v1934_v56 }
  0xfd   : > { %2311 = vst [vmem:[%s2615_s11 + $0x1a8] sm:$0xff] %v2207_v58  }
  0xff   : > { %v1057_v59 = vpop.f32.mrf.mxu2  ;;  %v1137_v60 = vpop.f32.mrf.mxu3 }
 0x100   : > { %v899_v61 = vpop.f32.mrf.mxu0  ;;  %v979_v62 = vpop.f32.mrf.mxu1  ;;  %v1058_v9 = vadd.f32 %v2607_v40, %v1057_v59  ;;  %v1138_v10 = vadd.f32 %v2607_v40, %v1137_v60 }
 0x101   : > { %v900_v1 = vadd.f32 %v2607_v40, %v899_v61  ;;  %v980_v2 = vadd.f32 %v2607_v40, %v979_v62 }
 0x103   : > { %v1972_v3 = vpack.c.bf16 %v900_v1, %v898_v63  ;;  %v2052_v4 = vpack.c.bf16 %v980_v2, %v978_v0 }
 0x105   : > { %2264 = vst [vmem:[%s2615_s11 + $0x30] sm:$0xff] %v1972_v3  }
 0x106   : > { %2280 = vst [vmem:[%s2615_s11 + $0xb0] sm:$0xff] %v2052_v4  }
 0x107   : > { %v1059_v5 = vpop.f32.mrf.mxu2  ;;  %v1139_v6 = vpop.f32.mrf.mxu3 }
 0x108   : > { %v1060_v11 = vadd.f32 %v2607_v40, %v1059_v5  ;;  %v1140_v12 = vadd.f32 %v2607_v40, %v1139_v6  ;;  %v902_v13 = vpop.f32.mrf.mxu0  ;;  %v982_v14 = vpop.f32.mrf.mxu1 }
 0x109   : > { %v903_v23 = vadd.f32 %v2607_v40, %v902_v13  ;;  %v983_v24 = vadd.f32 %v2607_v40, %v982_v14 }
 0x10a   : > { %v2132_v17 = vpack.c.bf16 %v1060_v11, %v1058_v9  ;;  %v2212_v18 = vpack.c.bf16 %v1140_v12, %v1138_v10 }
 0x10b   : > { %1814 = vmatmul.msk.bf16.gmra.mxu0 %vm665_vm0, %v1887_v7  ;;  %1830 = vmatmul.msk.bf16.gmra.mxu1 %vm665_vm0, %v1903_v8 }
 0x10c   : > { %2296 = vst [vmem:[%s2615_s11 + $0x130] sm:$0xff] %v2132_v17   ;;  %1846 = vmatmul.msk.bf16.gmra.mxu2 %vm665_vm0, %v1919_v15  ;;  %1862 = vmatmul.msk.bf16.gmra.mxu3 %vm665_vm0, %v1935_v16 }
 0x10d   : > { %2312 = vst [vmem:[%s2615_s11 + $0x1b0] sm:$0xff] %v2212_v18  }
 0x10f   : > { %v1062_v19 = vpop.f32.mrf.mxu2  ;;  %v1142_v20 = vpop.f32.mrf.mxu3 }
 0x110   : > { %v904_v21 = vpop.f32.mrf.mxu0  ;;  %v984_v22 = vpop.f32.mrf.mxu1  ;;  %v1063_v31 = vadd.f32 %v2607_v40, %v1062_v19  ;;  %v1143_v32 = vadd.f32 %v2607_v40, %v1142_v20 }
 0x111   : > { %v905_v25 = vadd.f32 %v2607_v40, %v904_v21  ;;  %v985_v26 = vadd.f32 %v2607_v40, %v984_v22 }
 0x113   : > { %v1977_v27 = vpack.c.bf16 %v905_v25, %v903_v23  ;;  %v2057_v28 = vpack.c.bf16 %v985_v26, %v983_v24 }
 0x115   : > { %2265 = vst [vmem:[%s2615_s11 + $0x38] sm:$0xff] %v1977_v27  }
 0x116   : > { %2281 = vst [vmem:[%s2615_s11 + $0xb8] sm:$0xff] %v2057_v28  }
 0x117   : > { %v1064_v29 = vpop.f32.mrf.mxu2  ;;  %v1144_v30 = vpop.f32.mrf.mxu3 }
 0x118   : > { %v1065_v33 = vadd.f32 %v2607_v40, %v1064_v29  ;;  %v1145_v34 = vadd.f32 %v2607_v40, %v1144_v30  ;;  %v907_v35 = vpop.f32.mrf.mxu0  ;;  %v987_v36 = vpop.f32.mrf.mxu1 }
 0x119   : > { %v908_v44 = vadd.f32 %v2607_v40, %v907_v35  ;;  %v988_v45 = vadd.f32 %v2607_v40, %v987_v36 }
 0x11a   : > { %v2137_v37 = vpack.c.bf16 %v1065_v33, %v1063_v31  ;;  %v2217_v38 = vpack.c.bf16 %v1145_v34, %v1143_v32 }
 0x11c   : > { %2297 = vst [vmem:[%s2615_s11 + $0x138] sm:$0xff] %v2137_v37  }
 0x11d   : > { %2313 = vst [vmem:[%s2615_s11 + $0x1b8] sm:$0xff] %v2217_v38  }
 0x11f   : > { %v1067_v39 = vpop.f32.mrf.mxu2  ;;  %v1147_v41 = vpop.f32.mrf.mxu3 }
 0x120   : > { %v909_v42 = vpop.f32.mrf.mxu0  ;;  %v989_v43 = vpop.f32.mrf.mxu1  ;;  %v1068_v52 = vadd.f32 %v2607_v40, %v1067_v39  ;;  %v1148_v53 = vadd.f32 %v2607_v40, %v1147_v41 }
 0x121   : > { %v910_v46 = vadd.f32 %v2607_v40, %v909_v42  ;;  %v990_v47 = vadd.f32 %v2607_v40, %v989_v43 }
 0x123   : > { %v1982_v48 = vpack.c.bf16 %v910_v46, %v908_v44  ;;  %v2062_v49 = vpack.c.bf16 %v990_v47, %v988_v45 }
 0x125   : > { %2266 = vst [vmem:[%s2615_s11 + $0x40] sm:$0xff] %v1982_v48  }
 0x126   : > { %2282 = vst [vmem:[%s2615_s11 + $0xc0] sm:$0xff] %v2062_v49  }
 0x127   : > { %v1069_v50 = vpop.f32.mrf.mxu2  ;;  %v1149_v51 = vpop.f32.mrf.mxu3 }
 0x128   : > { %v1070_v54 = vadd.f32 %v2607_v40, %v1069_v50  ;;  %v1150_v55 = vadd.f32 %v2607_v40, %v1149_v51  ;;  %v912_v56 = vpop.f32.mrf.mxu0  ;;  %v992_v57 = vpop.f32.mrf.mxu1 }
 0x129   : > { %v913_v0 = vadd.f32 %v2607_v40, %v912_v56  ;;  %v993_v1 = vadd.f32 %v2607_v40, %v992_v57 }
 0x12a   : > { %v2142_v58 = vpack.c.bf16 %v1070_v54, %v1068_v52  ;;  %v2222_v59 = vpack.c.bf16 %v1150_v55, %v1148_v53 }
 0x12c   : > { %2298 = vst [vmem:[%s2615_s11 + $0x140] sm:$0xff] %v2142_v58  }
 0x12d   : > { %2314 = vst [vmem:[%s2615_s11 + $0x1c0] sm:$0xff] %v2222_v59  }
 0x12f   : > { %v1072_v60 = vpop.f32.mrf.mxu2  ;;  %v1152_v61 = vpop.f32.mrf.mxu3 }
 0x130   : > { %v914_v62 = vpop.f32.mrf.mxu0  ;;  %v994_v63 = vpop.f32.mrf.mxu1  ;;  %v1073_v8 = vadd.f32 %v2607_v40, %v1072_v60  ;;  %v1153_v9 = vadd.f32 %v2607_v40, %v1152_v61 }
 0x131   : > { %v915_v2 = vadd.f32 %v2607_v40, %v914_v62  ;;  %v995_v3 = vadd.f32 %v2607_v40, %v994_v63 }
 0x133   : > { %v1987_v4 = vpack.c.bf16 %v915_v2, %v913_v0  ;;  %v2067_v5 = vpack.c.bf16 %v995_v3, %v993_v1 }
 0x135   : > { %2267 = vst [vmem:[%s2615_s11 + $0x48] sm:$0xff] %v1987_v4  }
 0x136   : > { %2283 = vst [vmem:[%s2615_s11 + $0xc8] sm:$0xff] %v2067_v5  }
 0x137   : > { %v1074_v6 = vpop.f32.mrf.mxu2  ;;  %v1154_v7 = vpop.f32.mrf.mxu3 }
 0x138   : > { %v1075_v10 = vadd.f32 %v2607_v40, %v1074_v6  ;;  %v1155_v11 = vadd.f32 %v2607_v40, %v1154_v7  ;;  %v917_v12 = vpop.f32.mrf.mxu0  ;;  %v997_v13 = vpop.f32.mrf.mxu1 }
 0x139   : > { %v918_v20 = vadd.f32 %v2607_v40, %v917_v12  ;;  %v998_v21 = vadd.f32 %v2607_v40, %v997_v13 }
 0x13a   : > { %v2147_v14 = vpack.c.bf16 %v1075_v10, %v1073_v8  ;;  %v2227_v15 = vpack.c.bf16 %v1155_v11, %v1153_v9 }
 0x13c   : > { %2299 = vst [vmem:[%s2615_s11 + $0x148] sm:$0xff] %v2147_v14  }
 0x13d   : > { %2315 = vst [vmem:[%s2615_s11 + $0x1c8] sm:$0xff] %v2227_v15  }
 0x13f   : > { %v1077_v16 = vpop.f32.mrf.mxu2  ;;  %v1157_v17 = vpop.f32.mrf.mxu3 }
 0x140   : > { %v919_v18 = vpop.f32.mrf.mxu0  ;;  %v999_v19 = vpop.f32.mrf.mxu1  ;;  %v1078_v28 = vadd.f32 %v2607_v40, %v1077_v16  ;;  %v1158_v29 = vadd.f32 %v2607_v40, %v1157_v17 }
 0x141   : > { %v920_v22 = vadd.f32 %v2607_v40, %v919_v18  ;;  %v1000_v23 = vadd.f32 %v2607_v40, %v999_v19 }
 0x143   : > { %v1992_v24 = vpack.c.bf16 %v920_v22, %v918_v20  ;;  %v2072_v25 = vpack.c.bf16 %v1000_v23, %v998_v21 }
 0x145   : > { %2268 = vst [vmem:[%s2615_s11 + $0x50] sm:$0xff] %v1992_v24  }
 0x146   : > { %2284 = vst [vmem:[%s2615_s11 + $0xd0] sm:$0xff] %v2072_v25  }
 0x147   : > { %v1079_v26 = vpop.f32.mrf.mxu2  ;;  %v1159_v27 = vpop.f32.mrf.mxu3 }
 0x148   : > { %v1080_v30 = vadd.f32 %v2607_v40, %v1079_v26  ;;  %v1160_v31 = vadd.f32 %v2607_v40, %v1159_v27  ;;  %v922_v32 = vpop.f32.mrf.mxu0  ;;  %v1002_v33 = vpop.f32.mrf.mxu1 }
 0x149   : > { %v923_v41 = vadd.f32 %v2607_v40, %v922_v32  ;;  %v1003_v42 = vadd.f32 %v2607_v40, %v1002_v33 }
 0x14a   : > { %v2152_v34 = vpack.c.bf16 %v1080_v30, %v1078_v28  ;;  %v2232_v35 = vpack.c.bf16 %v1160_v31, %v1158_v29 }
 0x14c   : > { %2300 = vst [vmem:[%s2615_s11 + $0x150] sm:$0xff] %v2152_v34  }
 0x14d   : > { %2316 = vst [vmem:[%s2615_s11 + $0x1d0] sm:$0xff] %v2232_v35  }
 0x14f   : > { %v1082_v36 = vpop.f32.mrf.mxu2  ;;  %v1162_v37 = vpop.f32.mrf.mxu3 }
 0x150   : > { %v924_v38 = vpop.f32.mrf.mxu0  ;;  %v1004_v39 = vpop.f32.mrf.mxu1  ;;  %v1083_v49 = vadd.f32 %v2607_v40, %v1082_v36  ;;  %v1163_v50 = vadd.f32 %v2607_v40, %v1162_v37 }
 0x151   : > { %v925_v43 = vadd.f32 %v2607_v40, %v924_v38  ;;  %v1005_v44 = vadd.f32 %v2607_v40, %v1004_v39 }
 0x153   : > { %v1997_v45 = vpack.c.bf16 %v925_v43, %v923_v41  ;;  %v2077_v46 = vpack.c.bf16 %v1005_v44, %v1003_v42 }
 0x155   : > { %2269 = vst [vmem:[%s2615_s11 + $0x58] sm:$0xff] %v1997_v45  }
 0x156   : > { %2285 = vst [vmem:[%s2615_s11 + $0xd8] sm:$0xff] %v2077_v46  }
 0x157   : > { %v1084_v47 = vpop.f32.mrf.mxu2  ;;  %v1164_v48 = vpop.f32.mrf.mxu3 }
 0x158   : > { %v1085_v51 = vadd.f32 %v2607_v40, %v1084_v47  ;;  %v1165_v52 = vadd.f32 %v2607_v40, %v1164_v48  ;;  %v927_v53 = vpop.f32.mrf.mxu0  ;;  %v1007_v54 = vpop.f32.mrf.mxu1 }
 0x159   : > { %v928_v61 = vadd.f32 %v2607_v40, %v927_v53  ;;  %v1008_v62 = vadd.f32 %v2607_v40, %v1007_v54 }
 0x15a   : > { %v2157_v55 = vpack.c.bf16 %v1085_v51, %v1083_v49  ;;  %v2237_v56 = vpack.c.bf16 %v1165_v52, %v1163_v50 }
 0x15c   : > { %2301 = vst [vmem:[%s2615_s11 + $0x158] sm:$0xff] %v2157_v55  }
 0x15d   : > { %2317 = vst [vmem:[%s2615_s11 + $0x1d8] sm:$0xff] %v2237_v56  }
 0x15f   : > { %v1087_v57 = vpop.f32.mrf.mxu2  ;;  %v1167_v58 = vpop.f32.mrf.mxu3 }
 0x160   : > { %v929_v59 = vpop.f32.mrf.mxu0  ;;  %v1009_v60 = vpop.f32.mrf.mxu1  ;;  %v1088_v5 = vadd.f32 %v2607_v40, %v1087_v57  ;;  %v1168_v6 = vadd.f32 %v2607_v40, %v1167_v58 }
 0x161   : > { %v930_v63 = vadd.f32 %v2607_v40, %v929_v59  ;;  %v1010_v0 = vadd.f32 %v2607_v40, %v1009_v60 }
 0x163   : > { %v2002_v1 = vpack.c.bf16 %v930_v63, %v928_v61  ;;  %v2082_v2 = vpack.c.bf16 %v1010_v0, %v1008_v62 }
 0x165   : > { %2270 = vst [vmem:[%s2615_s11 + $0x60] sm:$0xff] %v2002_v1  }
 0x166   : > { %2286 = vst [vmem:[%s2615_s11 + $0xe0] sm:$0xff] %v2082_v2  }
 0x167   : > { %v1089_v3 = vpop.f32.mrf.mxu2  ;;  %v1169_v4 = vpop.f32.mrf.mxu3 }
 0x168   : > { %v1090_v7 = vadd.f32 %v2607_v40, %v1089_v3  ;;  %v1170_v8 = vadd.f32 %v2607_v40, %v1169_v4  ;;  %v932_v9 = vpop.f32.mrf.mxu0  ;;  %v1012_v10 = vpop.f32.mrf.mxu1 }
 0x169   : > { %v933_v17 = vadd.f32 %v2607_v40, %v932_v9  ;;  %v1013_v18 = vadd.f32 %v2607_v40, %v1012_v10 }
 0x16a   : > { %v2162_v11 = vpack.c.bf16 %v1090_v7, %v1088_v5  ;;  %v2242_v12 = vpack.c.bf16 %v1170_v8, %v1168_v6 }
 0x16c   : > { %2302 = vst [vmem:[%s2615_s11 + $0x160] sm:$0xff] %v2162_v11  }
 0x16d   : > { %2318 = vst [vmem:[%s2615_s11 + $0x1e0] sm:$0xff] %v2242_v12  }
 0x16f   : > { %v1092_v13 = vpop.f32.mrf.mxu2  ;;  %v1172_v14 = vpop.f32.mrf.mxu3 }
 0x170   : > { %v934_v15 = vpop.f32.mrf.mxu0  ;;  %v1014_v16 = vpop.f32.mrf.mxu1  ;;  %v1093_v25 = vadd.f32 %v2607_v40, %v1092_v13  ;;  %v1173_v26 = vadd.f32 %v2607_v40, %v1172_v14 }
 0x171   : > { %v935_v19 = vadd.f32 %v2607_v40, %v934_v15  ;;  %v1015_v20 = vadd.f32 %v2607_v40, %v1014_v16 }
 0x173   : > { %v2007_v21 = vpack.c.bf16 %v935_v19, %v933_v17  ;;  %v2087_v22 = vpack.c.bf16 %v1015_v20, %v1013_v18 }
 0x175   : > { %2271 = vst [vmem:[%s2615_s11 + $0x68] sm:$0xff] %v2007_v21  }
 0x176   : > { %2287 = vst [vmem:[%s2615_s11 + $0xe8] sm:$0xff] %v2087_v22  }
 0x177   : > { %v1094_v23 = vpop.f32.mrf.mxu2  ;;  %v1174_v24 = vpop.f32.mrf.mxu3 }
 0x178   : > { %v1095_v27 = vadd.f32 %v2607_v40, %v1094_v23  ;;  %v1175_v28 = vadd.f32 %v2607_v40, %v1174_v24  ;;  %v937_v29 = vpop.f32.mrf.mxu0  ;;  %v1017_v30 = vpop.f32.mrf.mxu1 }
 0x179   : > { %v938_v37 = vadd.f32 %v2607_v40, %v937_v29  ;;  %v1018_v38 = vadd.f32 %v2607_v40, %v1017_v30 }
 0x17a   : > { %v2167_v31 = vpack.c.bf16 %v1095_v27, %v1093_v25  ;;  %v2247_v32 = vpack.c.bf16 %v1175_v28, %v1173_v26 }
 0x17c   : > { %2303 = vst [vmem:[%s2615_s11 + $0x168] sm:$0xff] %v2167_v31  }
 0x17d   : > { %2319 = vst [vmem:[%s2615_s11 + $0x1e8] sm:$0xff] %v2247_v32  }
 0x17f   : > { %v1097_v33 = vpop.f32.mrf.mxu2  ;;  %v1177_v34 = vpop.f32.mrf.mxu3 }
 0x180   : > { %v939_v35 = vpop.f32.mrf.mxu0  ;;  %v1019_v36 = vpop.f32.mrf.mxu1  ;;  %v1098_v46 = vadd.f32 %v2607_v40, %v1097_v33  ;;  %v1178_v47 = vadd.f32 %v2607_v40, %v1177_v34 }
 0x181   : > { %v940_v39 = vadd.f32 %v2607_v40, %v939_v35  ;;  %v1020_v41 = vadd.f32 %v2607_v40, %v1019_v36 }
 0x183   : > { %v2012_v42 = vpack.c.bf16 %v940_v39, %v938_v37  ;;  %v2092_v43 = vpack.c.bf16 %v1020_v41, %v1018_v38 }
 0x185   : > { %2272 = vst [vmem:[%s2615_s11 + $0x70] sm:$0xff] %v2012_v42  }
 0x186   : > { %2288 = vst [vmem:[%s2615_s11 + $0xf0] sm:$0xff] %v2092_v43  }
 0x187   : > { %v1099_v44 = vpop.f32.mrf.mxu2  ;;  %v1179_v45 = vpop.f32.mrf.mxu3 }
 0x188   : > { %v1100_v48 = vadd.f32 %v2607_v40, %v1099_v44  ;;  %v1180_v49 = vadd.f32 %v2607_v40, %v1179_v45  ;;  %v942_v50 = vpop.f32.mrf.mxu0  ;;  %v1022_v51 = vpop.f32.mrf.mxu1 }
 0x189   : > { %v943_v58 = vadd.f32 %v2607_v40, %v942_v50  ;;  %v1023_v59 = vadd.f32 %v2607_v40, %v1022_v51 }
 0x18a   : > { %v2172_v52 = vpack.c.bf16 %v1100_v48, %v1098_v46  ;;  %v2252_v53 = vpack.c.bf16 %v1180_v49, %v1178_v47 }
 0x18c   : > { %2304 = vst [vmem:[%s2615_s11 + $0x170] sm:$0xff] %v2172_v52  }
 0x18d   : > { %2320 = vst [vmem:[%s2615_s11 + $0x1f0] sm:$0xff] %v2252_v53  }
 0x18f   : > { %v1102_v54 = vpop.f32.mrf.mxu2  ;;  %v1182_v55 = vpop.f32.mrf.mxu3 }
 0x190   : > { %v944_v56 = vpop.f32.mrf.mxu0  ;;  %v1024_v57 = vpop.f32.mrf.mxu1  ;;  %v1103_v2 = vadd.f32 %v2607_v40, %v1102_v54  ;;  %v1183_v3 = vadd.f32 %v2607_v40, %v1182_v55 }
 0x191   : > { %v945_v60 = vadd.f32 %v2607_v40, %v944_v56  ;;  %v1025_v61 = vadd.f32 %v2607_v40, %v1024_v57 }
 0x193   : > { %v2017_v62 = vpack.c.bf16 %v945_v60, %v943_v58  ;;  %v2097_v63 = vpack.c.bf16 %v1025_v61, %v1023_v59 }
 0x195   : > { %2273 = vst [vmem:[%s2615_s11 + $0x78] sm:$0xff] %v2017_v62  }
 0x196   : > { %2289 = vst [vmem:[%s2615_s11 + $0xf8] sm:$0xff] %v2097_v63  }
 0x197   : > { %v1104_v0 = vpop.f32.mrf.mxu2  ;;  %v1184_v1 = vpop.f32.mrf.mxu3 }
 0x198   : > { %v1105_v4 = vadd.f32 %v2607_v40, %v1104_v0  ;;  %v1185_v5 = vadd.f32 %v2607_v40, %v1184_v1 }
 0x199   : > { %1450 = sbr.rel (!%p2505_p5) target bundleno = 445 (0x1bd), region = 36 }
 0x19a   : > { %v2177_v6 = vpack.c.bf16 %v1105_v4, %v1103_v2  ;;  %v2257_v7 = vpack.c.bf16 %v1185_v5, %v1183_v3 }
 0x19c   : > { %2305 = vst [vmem:[%s2615_s11 + $0x178] sm:$0xff] %v2177_v6  }
 0x19d   : > { %2321 = vst [vmem:[%s2615_s11 + $0x1f8] sm:$0xff] %v2257_v7  }
 0x19e   : > { %s2936_s19 = smov (!%p1453_p11, %s1452_s19), 128 }
 0x19f   : > { %s1865_s20 = sshll.u32 %s2936_s19, 2 }
 0x1a0   : > { %s1456_s24 = ssub.s32 512, %s1865_s20 }
 0x1a1   : > { %s1457_s25 = sshll.u32 %s1456_s24, 4 }
 0x1a2   : > { %1458 = vsyncadd %s2863_s17, %s1457_s25  ;;  %p2872_p12 = scmp.ne.s32.totalorder %s1865_s20, 0  ;;  %s1938_s22 = sshll.u32 %s2488_s16, 9 }
 0x1a3   : > { %s1461_s29 = scalar_lea.hbm %s2927_s3, %s1938_s22  ;;  %s1463_s30 = sshll.u32 %s2615_s11, 4  ;;  %s2881_s30 = int_to_ptr.vmem [resolvable:$true] %s1463_s30 }
 0x1a4   : > { %s1465_s4 = sshll.u32 %s1461_s29, 4  ;;  %s1869_s5 = sshll.u32 %s2936_s19, 6  ;;  %s2883_s4 = int_to_ptr.hbm [resolvable:$true] %s1465_s4 }
 0x1a5   : > { %s2369_s6 = sshra.s32 %s2881_s30, 4  ;;  %s2371_s7 = sshrl.u32 %s1869_s5, 4  ;;  %s2370_s6 = int_to_ptr.vmem [resolvable:$true] %s2369_s6 }
 0x1a6   : > { %s2376_s8 = scalar_lea.vmem %s2370_s6, %s2371_s7  ;;  %s2444_s16 = smov [#allocation2]  }
 0x1a7   : > { %p2377_p13 = scmp.ne.s32.totalorder %s2370_s6, %s2376_s8  ;;  %s2380_s9 = scalar_lea.vmem %s2444_s16, 1024 }
 0x1a8   : > { %p2382_p2 = scmp.lt.s32.totalorder %s2380_s9, %s2376_s8 }
 0x1a9   : > { %p2378_p0 = pnand %p2377_p13, %p2872_p12 }
 0x1ab   : > { %p2379_p1 = pneg %p2378_p0 }
 0x1ad   : > { %p2384_p3 = pnand %p2382_p2, %p2379_p1 }
 0x1af   : > { %2387 = shalt.err (!%p2384_p3)
}
 0x1b0   : > { %s2388_s10 = sshra.s32 %s2883_s4, 4  ;;  %s2399_s25 = scalar_lea.hbm %s2927_s3, 576  ;;  %s2389_s10 = int_to_ptr.hbm [resolvable:$true] %s2388_s10 }
 0x1b1   : > { %s2395_s11 = scalar_lea.hbm %s2389_s10, %s2371_s7  ;;  %p2400_p8 = scmp.lt.s32.totalorder %s2389_s10, %s2927_s3 }
 0x1b2   : > { %p2396_p4 = scmp.ne.s32.totalorder %s2389_s10, %s2395_s11  ;;  %p2401_p9 = scmp.lt.s32.totalorder %s2399_s25, %s2395_s11 }
 0x1b4   : > { %p2397_p5 = pnand %p2396_p4, %p2872_p12  ;;  %p2402_p10 = por %p2401_p9, %p2400_p8 }
 0x1b6   : > { %p2398_p7 = pneg %p2397_p5 }
 0x1b8   : > { %p2403_p11 = pnand %p2402_p10, %p2398_p7 }
 0x1ba   : > { %2406 = shalt.err (!%p2403_p11)
}
 0x1bb   : > { %s2445_s26 = smov 64   ;;  %s2446_s29 = smov 4  }
 0x1bc   : > { %1471 = dma.vmem_to_hbm [thread:$0]  (%p2872_p12), %s2881_s30, %s1869_s5, %s2883_s4, %s2863_s17, %s2445_s26, %s2445_s26, %s2446_s29  }
 0x1bd PF: > { %p2333_p13 = scmp.ge.s32.totalorder %s2442_s15, 2  ;;  %s1480_s6 = sand.u32 1, %s2430_s12  }
 0x1be   : > { %s1481_s7 = scalar_lea.sflag [#allocation3], %s1480_s6 }
 0x1bf   : > { %p2330_p0 = pnand %p2333_p13, %p2509_p6 }
 0x1c1   : > { %p2331_p1 = pneg %p2330_p0 }
 0x1c3   : > { %2425 = dma.done.wait (%p2331_p1), %s1481_s7, 8192  }
 0x1c4   : > { %2427 = vsyncadd (%p2331_p1), %s1481_s7, 4294959104  ;;  %p13_p2 = scmp.ge.s32.totalorder %s2492_s18, 4   ;;  %s2931_s12 = smov %s2434_s13 }
 0x1c5   : > { %s2932_s13 = smov %s2438_s14  ;;  %s2933_s14 = smov %s2503_s21 }
 0x1c6   : > { %s2934_s15 = smov %s2492_s18  ;;  %15 = sbr.rel (!%p13_p2) target bundleno = 3 (0x3), region = 67 }
 0x1cb   :  { %1487 = vsyncpa [#allocation3], 1 }
 0x1cc   :  { %1489 = vsyncpa [#allocation3 + $0x1], 1 }

</bundles_post_ra>
